<compile_context>
chip_gen: v7x
topology: tpu7x:2x2x1
jax: 0.10.0
libtpu: 0.0.40
codegen_flags: <defaults>
</compile_context>

<pallas_src>
import jax
import jax.numpy as jnp
from jax.experimental import pallas as pl
from jax.experimental.pallas import tpu as pltpu

LANE = 128          # TPU lane width; last dim of every block
MAX_TILE_ROWS = 1024  # 1024*128*4B = 512 KiB per channel slab; 1.5 MiB per 3-ch buffer


def _hsv_kernel(x_ref, o_ref):
    # x_ref / o_ref: (1, 3, TILE_R, 128) f32 blocks. Channel axis: RGB in, HSV out.
    r = x_ref[0, 0]
    g = x_ref[0, 1]
    b = x_ref[0, 2]

    v = jnp.maximum(jnp.maximum(r, g), b)            # V = max(R, G, B)
    mn = jnp.minimum(jnp.minimum(r, g), b)
    delta = v - mn
    nz = delta > 0.0
    d_safe = jnp.where(nz, delta, 1.0)
    inv_d = 1.0 / d_safe                              # EUP; exact to match reference

    # Hue: skimage tie-break order (blue-max overrides green-max overrides red-max).
    h_raw = jnp.where(b == v, 4.0 + (r - g) * inv_d,
                      jnp.where(g == v, 2.0 + (b - r) * inv_d,
                                (g - b) * inv_d))
    h6 = h_raw * (1.0 / 6.0)
    h = jnp.where(nz, h6 - jnp.floor(h6), 0.0)       # == (h_raw/6) % 1, 0 if delta==0

    # Saturation: delta / V, defined as 0 where delta == 0.
    v_safe = jnp.where(v > 0.0, v, 1.0)
    s = jnp.where(nz, delta * (1.0 / v_safe), 0.0)

    o_ref[0, 0] = h
    o_ref[0, 1] = s
    o_ref[0, 2] = v


def hsv_transform_pallas(x_nchw):
    """x_nchw: (N, 3, H, W) float RGB in [0, 1]  ->  (N, 3, H, W) HSV."""
    N, C, H, W = x_nchw.shape
    assert C == 3, "HSV conversion needs exactly 3 (RGB) channels"
    in_dtype = x_nchw.dtype
    HW = H * W
    x = x_nchw.astype(jnp.float32).reshape(N, 3, HW)   # free reshape, no transpose

    # Lane-dense spatial layout: HW -> (rows, 128). Rows are padded to a multiple
    # of the row tile (multiple of 8 sublanes); zero pad maps to HSV (0,0,0) and is
    # sliced off afterwards.
    R = pl.cdiv(HW, LANE)
    r8 = ((R + 7) // 8) * 8
    TILE_R = r8 if r8 <= MAX_TILE_ROWS else MAX_TILE_ROWS
    R_pad = pl.cdiv(R, TILE_R) * TILE_R
    HW_pad = R_pad * LANE
    if HW_pad != HW:
        x = jnp.pad(x, ((0, 0), (0, 0), (0, HW_pad - HW)))
    x4 = x.reshape(N, 3, R_pad, LANE)

    grid = (N, R_pad // TILE_R)
    out4 = pl.pallas_call(
        _hsv_kernel,
        out_shape=jax.ShapeDtypeStruct((N, 3, R_pad, LANE), jnp.float32),
        grid=grid,
        in_specs=[pl.BlockSpec((1, 3, TILE_R, LANE), lambda n, t: (n, 0, t, 0))],
        out_specs=pl.BlockSpec((1, 3, TILE_R, LANE), lambda n, t: (n, 0, t, 0)),
        compiler_params=pltpu.CompilerParams(
            dimension_semantics=("parallel", "parallel"),
            vmem_limit_bytes=32 * 1024 * 1024),
    )(x4)

    out = out4.reshape(N, 3, HW_pad)[:, :, :HW].reshape(N, 3, H, W)
    return out.astype(in_dtype)


# ----------------------------- JAX reference ---------------------------------------
def hsv_transform_reference(x):
    """Pure-JAX mirror of skimage.color.rgb2hsv applied per image (NCHW in/out)."""
    x = x.astype(jnp.float32)
    r, g, b = x[:, 0], x[:, 1], x[:, 2]
    v = jnp.maximum(jnp.maximum(r, g), b)
    mn = jnp.minimum(jnp.minimum(r, g), b)
    delta = v - mn
    nz = delta > 0.0
    d_safe = jnp.where(nz, delta, 1.0)
    h_raw = jnp.where(b == v, 4.0 + (r - g) / d_safe,
                      jnp.where(g == v, 2.0 + (b - r) / d_safe,
                                (g - b) / d_safe))
    h6 = h_raw / 6.0
    h = jnp.where(nz, h6 - jnp.floor(h6), 0.0)
    v_safe = jnp.where(v > 0.0, v, 1.0)
    s = jnp.where(nz, delta / v_safe, 0.0)
    return jnp.stack([h, s, v], axis=1)


if __name__ == "__main__":
    # TODO(synk): the PyTorch module's .detach().cpu().numpy() / .cuda(0) host
    # round-trip is device-placement glue with no Pallas equivalent; the rgb2hsv
    # math itself is implemented natively above.
    key = jax.random.PRNGKey(0)
    N, C, H, W = 2, 3, 16, 16
    x = jax.random.uniform(key, (N, C, H, W), jnp.float32)  # RGB in [0, 1]

    out = jax.block_until_ready(hsv_transform_pallas(x))
    ref = hsv_transform_reference(x)

    err = float(jnp.max(jnp.abs(out - ref)))
    if out.shape != ref.shape or err > 1e-5:
        raise AssertionError(
            f"mismatch: shape {out.shape} vs {ref.shape}, max abs err {err:.3e}")
    print("KERNEL_OK")
</pallas_src>

<mosaic_0001>
module attributes {stable_mosaic.version = 11 : i64} {
  func.func @_hsv_kernel(%arg0: i32, %arg1: i32, %arg2: memref<1x3x8x128xf32, #tpu.memory_space<vmem>>, %arg3: memref<1x3x8x128xf32, #tpu.memory_space<vmem>>) attributes {dimension_semantics = [#tpu.dimension_semantics<parallel>, #tpu.dimension_semantics<parallel>], iteration_bounds = array<i64: 2, 1>, scalar_prefetch = 0 : i64, scratch_operands = 0 : i64, tpu.core_type = #tpu.core_type<tc>, window_params = [{transform_indices = @transform_0, window_bounds = array<i64: 1, 3, 8, 128>}, {transform_indices = @transform_1, window_bounds = array<i64: 1, 3, 8, 128>}]} {
    %c0 = arith.constant 0 : index
    %c0_0 = arith.constant 0 : index
    %c0_1 = arith.constant 0 : index
    %c0_2 = arith.constant 0 : index
    %0 = vector.load %arg2[%c0, %c0_0, %c0_1, %c0_2] : memref<1x3x8x128xf32, #tpu.memory_space<vmem>>, vector<1x1x8x128xf32>
    %1 = vector.shape_cast %0 : vector<1x1x8x128xf32> to vector<8x128xf32>
    %c0_3 = arith.constant 0 : index
    %c1 = arith.constant 1 : index
    %c0_4 = arith.constant 0 : index
    %c0_5 = arith.constant 0 : index
    %2 = vector.load %arg2[%c0_3, %c1, %c0_4, %c0_5] : memref<1x3x8x128xf32, #tpu.memory_space<vmem>>, vector<1x1x8x128xf32>
    %3 = vector.shape_cast %2 : vector<1x1x8x128xf32> to vector<8x128xf32>
    %c0_6 = arith.constant 0 : index
    %c2 = arith.constant 2 : index
    %c0_7 = arith.constant 0 : index
    %c0_8 = arith.constant 0 : index
    %4 = vector.load %arg2[%c0_6, %c2, %c0_7, %c0_8] : memref<1x3x8x128xf32, #tpu.memory_space<vmem>>, vector<1x1x8x128xf32>
    %5 = vector.shape_cast %4 : vector<1x1x8x128xf32> to vector<8x128xf32>
    %6 = arith.maximumf %1, %3 : vector<8x128xf32>
    %7 = arith.maximumf %6, %5 : vector<8x128xf32>
    %8 = arith.minimumf %1, %3 : vector<8x128xf32>
    %9 = arith.minimumf %8, %5 : vector<8x128xf32>
    %10 = arith.subf %7, %9 : vector<8x128xf32>
    %cst = arith.constant 0.000000e+00 : f32
    %11 = vector.broadcast %cst : f32 to vector<8x128xf32>
    %12 = arith.cmpf ogt, %10, %11 : vector<8x128xf32>
    %cst_9 = arith.constant 1.000000e+00 : f32
    %13 = vector.broadcast %cst_9 : f32 to vector<8x128xf32>
    %14 = arith.select %12, %10, %13 : vector<8x128xi1>, vector<8x128xf32>
    %cst_10 = arith.constant 1.000000e+00 : f32
    %15 = vector.broadcast %cst_10 : f32 to vector<8x128xf32>
    %16 = arith.divf %15, %14 : vector<8x128xf32>
    %17 = arith.cmpf oeq, %5, %7 : vector<8x128xf32>
    %18 = arith.subf %1, %3 : vector<8x128xf32>
    %19 = arith.mulf %18, %16 : vector<8x128xf32>
    %cst_11 = arith.constant 4.000000e+00 : f32
    %20 = vector.broadcast %cst_11 : f32 to vector<8x128xf32>
    %21 = arith.addf %20, %19 : vector<8x128xf32>
    %22 = arith.cmpf oeq, %3, %7 : vector<8x128xf32>
    %23 = arith.subf %5, %1 : vector<8x128xf32>
    %24 = arith.mulf %23, %16 : vector<8x128xf32>
    %cst_12 = arith.constant 2.000000e+00 : f32
    %25 = vector.broadcast %cst_12 : f32 to vector<8x128xf32>
    %26 = arith.addf %25, %24 : vector<8x128xf32>
    %27 = arith.subf %3, %5 : vector<8x128xf32>
    %28 = arith.mulf %27, %16 : vector<8x128xf32>
    %29 = arith.select %22, %26, %28 : vector<8x128xi1>, vector<8x128xf32>
    %30 = arith.select %17, %21, %29 : vector<8x128xi1>, vector<8x128xf32>
    %cst_13 = arith.constant 0.166666672 : f32
    %31 = vector.broadcast %cst_13 : f32 to vector<8x128xf32>
    %32 = arith.mulf %30, %31 : vector<8x128xf32>
    %33 = math.floor %32 : vector<8x128xf32>
    %34 = arith.subf %32, %33 : vector<8x128xf32>
    %cst_14 = arith.constant 0.000000e+00 : f32
    %35 = vector.broadcast %cst_14 : f32 to vector<8x128xf32>
    %36 = arith.select %12, %34, %35 : vector<8x128xi1>, vector<8x128xf32>
    %cst_15 = arith.constant 0.000000e+00 : f32
    %37 = vector.broadcast %cst_15 : f32 to vector<8x128xf32>
    %38 = arith.cmpf ogt, %7, %37 : vector<8x128xf32>
    %cst_16 = arith.constant 1.000000e+00 : f32
    %39 = vector.broadcast %cst_16 : f32 to vector<8x128xf32>
    %40 = arith.select %38, %7, %39 : vector<8x128xi1>, vector<8x128xf32>
    %cst_17 = arith.constant 1.000000e+00 : f32
    %41 = vector.broadcast %cst_17 : f32 to vector<8x128xf32>
    %42 = arith.divf %41, %40 : vector<8x128xf32>
    %43 = arith.mulf %10, %42 : vector<8x128xf32>
    %cst_18 = arith.constant 0.000000e+00 : f32
    %44 = vector.broadcast %cst_18 : f32 to vector<8x128xf32>
    %45 = arith.select %12, %43, %44 : vector<8x128xi1>, vector<8x128xf32>
    %c0_19 = arith.constant 0 : index
    %c0_20 = arith.constant 0 : index
    %c0_21 = arith.constant 0 : index
    %c0_22 = arith.constant 0 : index
    %46 = vector.load %arg3[%c0_19, %c0_20, %c0_21, %c0_22] : memref<1x3x8x128xf32, #tpu.memory_space<vmem>>, vector<1x1x8x128xf32>
    %47 = vector.shape_cast %46 : vector<1x1x8x128xf32> to vector<8x128xf32>
    %48 = vector.shape_cast %36 : vector<8x128xf32> to vector<1x1x8x128xf32>
    tpu.vector_store %arg3[%c0_19, %c0_20, %c0_21, %c0_22], %48 {strides = array<i32>} : memref<1x3x8x128xf32, #tpu.memory_space<vmem>>, vector<1x1x8x128xf32>,
    %c0_23 = arith.constant 0 : index
    %c1_24 = arith.constant 1 : index
    %c0_25 = arith.constant 0 : index
    %c0_26 = arith.constant 0 : index
    %49 = vector.load %arg3[%c0_23, %c1_24, %c0_25, %c0_26] : memref<1x3x8x128xf32, #tpu.memory_space<vmem>>, vector<1x1x8x128xf32>
    %50 = vector.shape_cast %49 : vector<1x1x8x128xf32> to vector<8x128xf32>
    %51 = vector.shape_cast %45 : vector<8x128xf32> to vector<1x1x8x128xf32>
    tpu.vector_store %arg3[%c0_23, %c1_24, %c0_25, %c0_26], %51 {strides = array<i32>} : memref<1x3x8x128xf32, #tpu.memory_space<vmem>>, vector<1x1x8x128xf32>,
    %c0_27 = arith.constant 0 : index
    %c2_28 = arith.constant 2 : index
    %c0_29 = arith.constant 0 : index
    %c0_30 = arith.constant 0 : index
    %52 = vector.load %arg3[%c0_27, %c2_28, %c0_29, %c0_30] : memref<1x3x8x128xf32, #tpu.memory_space<vmem>>, vector<1x1x8x128xf32>
    %53 = vector.shape_cast %52 : vector<1x1x8x128xf32> to vector<8x128xf32>
    %54 = vector.shape_cast %7 : vector<8x128xf32> to vector<1x1x8x128xf32>
    tpu.vector_store %arg3[%c0_27, %c2_28, %c0_29, %c0_30], %54 {strides = array<i32>} : memref<1x3x8x128xf32, #tpu.memory_space<vmem>>, vector<1x1x8x128xf32>,
    return
  }
  func.func @transform_0(%arg0: i32, %arg1: i32) -> (i32, i32, i32, i32) {
    %c0_i32 = arith.constant 0 : i32
    %c0_i32_0 = arith.constant 0 : i32
    %c0_i32_1 = arith.constant 0 : i32
    return %arg0, %c0_i32, %arg1, %c0_i32_0 : i32, i32, i32, i32
  }
  func.func @transform_1(%arg0: i32, %arg1: i32) -> (i32, i32, i32, i32) {
    %c0_i32 = arith.constant 0 : i32
    %c0_i32_0 = arith.constant 0 : i32
    %c0_i32_1 = arith.constant 0 : i32
    return %arg0, %c0_i32, %arg1, %c0_i32_0 : i32, i32, i32, i32
  }
}

</mosaic_0001>

<bundles_post_ra>
// kernel: tpu_custom_call.1
= control target key start
LH: loop header
LB: loop body
LE: loop exit
PB: predicated region body
PF: predicated region fallthrough
CT: control target
= control target key end

     0   :  { %6 = vsyncpa [#allocation3], 0  ;;  %s694_s0 = inlined_call_operand.hbm [shape: f32[2,3,8,128], index: 0, kind: input, shape index: {}]   ;;  %s695_s1 = inlined_call_operand.hbm [shape: f32[2,3,8,128], index: 1, kind: output, shape index: {}]  }
   0x1   :  { %8 = vsyncpa [#allocation3 + $0x1], 0 }
   0x2   :  { %9 = vsyncpa [#allocation4], 0 }
   0x3   :  { %11 = vsyncpa [#allocation4 + $0x1], 0  ;;  %s510_s6 = smov 0   ;;  %s512_s7 = smov 0  }
   0x4   :  { %s514_s8 = smov 0   ;;  %s516_s9 = smov 0  }
   0x5   :  { %s518_s10 = smov 0   ;;  %s520_s11 = smov 0  }
   0x6 LB: > { %s293_s12 = sadd.s32 4294967295, %s492_s11   ;;  %s294_s13 = sadd.s32 4294967294, %s492_s11   ;;  %s492_s11 = sphi %s520_s11, %s17_s11   ;;  %s488_s10 = sphi %s518_s10, %s710_s10   ;;  %s484_s9 = sphi %s516_s9, %s709_s9   ;;  %s480_s8 = sphi %s514_s8, %s708_s8   ;;  %s476_s7 = sphi %s512_s7, %s707_s7   ;;  %s472_s6 = sphi %s510_s6, %s706_s6  }
   0x7   : > { %s29_s14 = sadd.s32 1, %s488_s10  ;;  %s38_s15 = sadd.s32 1, %s480_s8 }
   0x8   : > { %p31_p0 = scmp.ge.s32.totalorder %s29_s14, 2  ;;  %p45_p1 = scmp.ne.s32.totalorder %s480_s8, %s476_s7 }
   0x9   : > { %p46_p2 = scmp.eq.s32.totalorder %s492_s11, 0  ;;  %p51_p3 = scmp.ne.s32.totalorder %s476_s7, %s472_s6 }
   0xa   : > { %s712_s14 = smov (%p31_p0, %s29_s14), 0  ;;  %p52_p5 = scmp.eq.s32.totalorder %s293_s12, 0 }
   0xb   : > { %p551_p4 = por %p46_p2, %p45_p1  ;;  %s33_s17 = ssub.s32 %s488_s10, %s712_s14 }
   0xc   : > { %p77_p6 = scmp.eq.s32.totalorder %s293_s12, 1  ;;  %p36_p7 = scmp.eq.s32.totalorder %s33_s17, 0 }
   0xd   : > { %p557_p8 = por %p52_p5, %p51_p3  ;;  %p83_p10 = scmp.eq.s32.totalorder %s294_s13, 1 }
   0xe   : > { %p561_p9 = por %p77_p6, %p45_p1  ;;  %p322_p13 = scmp.lt.s32.totalorder %s492_s11, 2 }
   0xf   : > { %s566_s20 = scalar_select %p36_p7, %s480_s8, %s38_s15  }
  0x10   : > { %s699_s19 = scalar_select %p561_p9, 1, 0 }
  0x11   : > { %p568_p11 = por %p83_p10, %p51_p3  ;;  %s103_s22 = sand.u32 1, %s480_s8  }
  0x12   : > { %s306_s23 = smul.u32 24, %s103_s22  ;;  %p578_p0 = pnand %p322_p13, %p551_p4 }
  0x13   : > { %s700_s21 = scalar_select %p568_p11, 1, 0 }
  0x14   : > { %s307_s24 = smul.u32 384, %s488_s10  ;;  %s107_s29 = scalar_lea.vmem [#allocation2], %s306_s23 }
  0x15   : > { %s115_s30 = sshll.u32 %s107_s29, 4  ;;  %s590_s2 = scalar_lea.sflag [#allocation3], %s103_s22  ;;  %s587_s30 = int_to_ptr.vmem [resolvable:$true] %s115_s30 }
  0x16   : > { %s585_s28 = scalar_lea.hbm %s694_s0, %s307_s24  ;;  %p382_p3 = pneg %p578_p0 }
  0x17   : > { %s380_s3 = scalar_lea.hbm %s585_s28, 384  ;;  %s385_s12 = scalar_lea.hbm %s694_s0, 768 }
  0x18   : > { %p381_p2 = scmp.ne.s32.totalorder %s585_s28, %s380_s3  ;;  %p386_p6 = scmp.lt.u32.totalorder %s585_s28, %s694_s0 }
  0x19   : > { %p387_p7 = scmp.lt.u32.totalorder %s385_s12, %s380_s3  ;;  %p389_p13 = scmp.lt.u32.totalorder %s380_s3, %s585_s28 }
  0x1a   : > { %p383_p4 = pnand %p382_p3, %p381_p2 }
  0x1b   : > { %p388_p10 = por %p387_p7, %p386_p6 }
  0x1c   : > { %p384_p5 = pneg %p383_p4 }
  0x1d   : > { %p390_p12 = por %p389_p13, %p388_p10 }
  0x1f   : > { %p391_p1 = pnand %p390_p12, %p384_p5 }
  0x21   : > { %394 = shalt.err (!%p391_p1)
}
  0x22   : > { %s395_s16 = scalar_lea.vmem %s587_s30, 384  ;;  %s494_s17 = smov [#allocation2]  }
  0x23   : > { %p396_p2 = scmp.ne.s32.totalorder %s587_s30, %s395_s16  ;;  %s400_s22 = sshll.u32 %s494_s17, 4  ;;  %s401_s22 = int_to_ptr.vmem [resolvable:$false] %s400_s22 }
  0x24   : > { %s402_s23 = scalar_lea.vmem %s401_s22, 768  ;;  %p403_p9 = scmp.lt.s32.totalorder %s587_s30, %s401_s22 }
  0x25   : > { %p398_p4 = pnand %p396_p2, %p382_p3  ;;  %p404_p6 = scmp.lt.s32.totalorder %s402_s23, %s395_s16 }
  0x27   : > { %p399_p11 = pneg %p398_p4  ;;  %p405_p7 = por %p404_p6, %p403_p9 }
  0x29   : > { %p406_p10 = pnand %p405_p7, %p399_p11 }
  0x2b   : > { %409 = shalt.err (!%p406_p10)
}
  0x2c   : > { %s495_s24 = smov 128   ;;  %s496_s26 = smov 8  }
  0x2d   : > { %317 = dma.hbm_to_vmem [thread:$0]  (!%p578_p0), %s585_s28, 384, %s587_s30, %s590_s2, %s495_s24, %s495_s24, %s496_s26  }
  0x2e   : > { %p123_p12 = scmp.lt.s32.totalorder %s492_s11, 3  ;;  %p702_p1 = scmp.ge.s32.totalorder %s492_s11, 1 }
  0x30   : > { %p124_p3 = pnand %p702_p1, %p123_p12 }
  0x31   : > { %s622_s27 = sand.u32 (!%p124_p3), 1, %s476_s7  }
  0x32   : > { %127 = sbr.rel (%p124_p3) target bundleno = 106 (0x6a), region = 24  ;;  %s130_s3 = scalar_lea.sflag (!%p124_p3), [#allocation3], %s622_s27 }
  0x33   : > { %s308_s29 = smul.u32 (!%p124_p3), 24, %s622_s27 }
  0x35   : > { %s133_s4 = scalar_lea.vmem (!%p124_p3), [#allocation2], %s308_s29 }
  0x39   : > { %463 = dma.done.wait (%p557_p8), %s130_s3, 384  }
  0x3a   : > { %465 = vsyncadd (%p557_p8), %s130_s3, 4294966912  ;;  %v152_v0 = vld [vmem:[%s133_s4] sm:$0xff]  ;;  %v299_v1 = vld [vmem:[%s133_s4 + $0x8] sm:$0xff]  ;;  %s630_s25 = scalar_lea.vmem [#allocation5], %s308_s29  ;;  %s309_s28 = smul.u32 384, %s484_s9 }
  0x3b   : > { %v300_v2 = vld [vmem:[%s133_s4 + $0x10] sm:$0xff]  ;;  %v157_v3 = vmax.f32 %v152_v0, %v299_v1  ;;  %v159_v4 = vmin.f32 %v152_v0, %v299_v1  ;;  %v167_v10 = vsub.f32 %v152_v0, %v299_v1  ;;  %s208_s18 = sshll.u32 %s630_s25, 4  ;;  %s194_s12 = scalar_lea.sflag [#allocation4], %s622_s27  ;;  %s638_s18 = int_to_ptr.vmem [resolvable:$true] %s208_s18 }
  0x3c   : > { %v171_v11 = vsub.f32 %v300_v2, %v152_v0  ;;  %v174_v12 = vsub.f32 %v299_v1, %v300_v2  ;;  %s643_s5 = scalar_lea.hbm %s695_s1, %s309_s28  ;;  %s410_s13 = scalar_lea.vmem %s638_s18, 384 }
  0x3d   : > { %v158_v5 = vmax.f32 %v157_v3, %v300_v2  ;;  %v160_v6 = vmin.f32 %v159_v4, %v300_v2  ;;  %p411_p8 = scmp.ne.s32.totalorder %s638_s18, %s410_s13  ;;  %p703_p9 = scmp.ne.s32.totalorder %s699_s19, 0 }
  0x3e   : > { %s497_s9 = smov [#allocation5]  }
  0x3f   : > { %v161_v7 = vsub.f32 %v158_v5, %v160_v6  ;;  %302 = vst [vmem:[%s630_s25 + $0x10] sm:$0xff] %v158_v5  ;;  %vm182_vm0 = vcmp.gt.f32.partialorder %v158_v5, 0.0  ;;  %vm170_vm2 = vcmp.eq.f32.partialorder %v299_v1, %v158_v5  ;;  %vm166_vm3 = vcmp.eq.f32.partialorder %v300_v2, %v158_v5  ;;  %p412_p11 = pnand %p411_p8, %p703_p9  ;;  %s414_s15 = sshll.u32 %s497_s9, 4  ;;  %s415_s15 = int_to_ptr.vmem [resolvable:$false] %s414_s15 }
  0x40   : > { %v183_v8 = vsel %vm182_vm0, %v158_v5, 1.0  ;;  %s416_s16 = scalar_lea.vmem %s415_s15, 768  ;;  %p417_p5 = scmp.lt.s32.totalorder %s638_s18, %s415_s15 }
  0x41   : > { %vm162_vm1 = vcmp.gt.f32.partialorder %v161_v7, 0.0  ;;  %376 = vrcp.f32 %v183_v8  ;;  %p413_p0 = pneg %p412_p11  ;;  %p418_p13 = scmp.lt.s32.totalorder %s416_s16, %s410_s13 }
  0x42   : > { %v163_v9 = vsel %vm162_vm1, %v161_v7, 1.0 }
  0x43   : > { %378 = vrcp.f32 %v163_v9  ;;  %p419_p2 = por %p418_p13, %p417_p5 }
  0x45   : > { %p420_p4 = pnand %p419_p2, %p413_p0 }
  0x4b   : > { %v377_v13 = vpop.eup %376 }
  0x4c   : > { %v186_v14 = vmul.f32 %v377_v13, %v161_v7 }
  0x4d   : > { %v379_v15 = vpop.eup %378 }
  0x4e   : > { %v168_v16 = vmul.f32 %v379_v15, %v167_v10  ;;  %v172_v17 = vmul.f32 %v379_v15, %v171_v11  ;;  %v175_v18 = vmul.f32 %v379_v15, %v174_v12  ;;  %v187_v19 = vsel %vm162_vm1, %v186_v14, 0.0 }
  0x4f   : > { %301 = vst [vmem:[%s630_s25 + $0x8] sm:$0xff] %v187_v19 }
  0x50   : > { %v169_v20 = vadd.f32 4.0, %v168_v16  ;;  %v173_v21 = vadd.f32 2.0, %v172_v17 }
  0x52   : > { %v176_v22 = vsel %vm170_vm2, %v173_v21, %v175_v18 }
  0x53   : > { %v177_v23 = vsel %vm166_vm3, %v169_v20, %v176_v22 }
  0x54   : > { %v178_v24 = vmul.f32 0.16666667, %v177_v23 }
  0x56   : > { %v179_v25 = vfloor.f32 %v178_v24 }
  0x58   : > { %v180_v26 = vsub.f32 %v178_v24, %v179_v25 }
  0x5a   : > { %v181_v27 = vsel %vm162_vm1, %v180_v26, 0.0 }
  0x5b   : > { %188 = vst [vmem:[%s630_s25] sm:$0xff] %v181_v27 }
  0x5c   : > { %423 = shalt.err (!%p420_p4)
}
  0x5d   : > { %s424_s17 = scalar_lea.hbm %s643_s5, 384  ;;  %s428_s24 = scalar_lea.hbm %s695_s1, 768 }
  0x5e   : > { %p425_p6 = scmp.ne.s32.totalorder %s643_s5, %s424_s17  ;;  %p429_p12 = scmp.lt.u32.totalorder %s643_s5, %s695_s1 }
  0x5f   : > { %p430_p1 = scmp.lt.u32.totalorder %s428_s24, %s424_s17  ;;  %p432_p8 = scmp.lt.u32.totalorder %s424_s17, %s643_s5 }
  0x60   : > { %p426_p7 = pnand %p425_p6, %p703_p9 }
  0x61   : > { %p431_p3 = por %p430_p1, %p429_p12 }
  0x62   : > { %p427_p10 = pneg %p426_p7 }
  0x63   : > { %p433_p11 = por %p432_p8, %p431_p3 }
  0x65   : > { %p434_p0 = pnand %p433_p11, %p427_p10 }
  0x67   : > { %437 = shalt.err (!%p434_p0)
}
  0x68   : > { %s498_s3 = smov 128   ;;  %s499_s4 = smov 8  }
  0x69   : > { %312 = dma.vmem_to_hbm [thread:$0]  (%p703_p9), %s638_s18, 384, %s643_s5, %s194_s12, %s498_s3, %s498_s3, %s499_s4  }
  0x6a PF: > { %s223_s25 = sand.u32 1, %s472_s6   ;;  %p704_p5 = scmp.ne.s32.totalorder %s700_s21, 0 }
  0x6b   : > { %p705_p13 = scmp.ge.s32.totalorder %s492_s11, 2  ;;  %s224_s28 = scalar_lea.sflag [#allocation4], %s223_s25 }
  0x6d   : > { %p319_p2 = pnand %p705_p13, %p704_p5 }
  0x6f   : > { %467 = dma.done.wait (!%p319_p2), %s224_s28, 384  }
  0x70   : > { %469 = vsyncadd (!%p319_p2), %s224_s28, 4294966912  ;;  %s17_s11 = sadd.s32 1, %s492_s11   ;;  %s706_s6 = smov %s476_s7 }
  0x71   : > { %p14_p4 = scmp.ge.s32.totalorder %s17_s11, 4   ;;  %s707_s7 = smov %s480_s8 }
  0x72   : > { %s708_s8 = smov %s566_s20  ;;  %s709_s9 = smov %s488_s10 }
  0x73   : > { %s710_s10 = smov %s712_s14  ;;  %16 = sbr.rel (!%p14_p4) target bundleno = 6 (0x6), region = 73 }
  0x7a   :  { %229 = vsyncpa [#allocation3], 1 }
  0x7b   :  { %231 = vsyncpa [#allocation3 + $0x1], 1 }
  0x7c   :  { %232 = vsyncpa [#allocation4], 1 }
  0x7d   :  { %234 = vsyncpa [#allocation4 + $0x1], 1 }

</bundles_post_ra>
